<compile_context>
chip_gen: v6e
topology: v6e:2x2x1
jax: 0.10.0
libtpu: 0.0.40
codegen_flags: <defaults>
</compile_context>

<pallas_src>
import functools

import jax
import jax.numpy as jnp
import numpy as np
from jax.experimental import pallas as pl
from jax.experimental.pallas import tpu as pltpu


def _round_up(a: int, b: int) -> int:
    return (a + b - 1) // b * b


def gcn_layer_kernel(s_ref, z_ref, w_ref, b_ref, o_ref, acc_ref, *,
                     activation: str, valid_cols: int):
    """One GCNConv layer, row-tiled:  out = act( (S @ Z) @ W + b ).

    Grid = (row tiles i ["parallel"], contraction tiles k ["arbitrary"]).
    acc_ref accumulates the aggregation S @ Z for the current row tile in fp32.
    """
    k = pl.program_id(1)

    @pl.when(k == 0)
    def _():
        acc_ref[...] = jnp.zeros_like(acc_ref)

    # Neighbour aggregation: (TM, TK)bf16 @ (TK, Fin)bf16 -> fp32 accumulate (MXU).
    acc_ref[...] += jnp.dot(s_ref[...], z_ref[...],
                            preferred_element_type=jnp.float32)

    @pl.when(k == pl.num_programs(1) - 1)
    def _():
        # Feature transform once per row tile: (TM, Fin) @ (Fin, Fout) + b.
        h = jnp.dot(acc_ref[...].astype(jnp.bfloat16), w_ref[...],
                    preferred_element_type=jnp.float32) + b_ref[...]
        if activation == "relu":
            h = jnp.maximum(h, 0.0)
        elif activation == "softmax":
            # Row softmax (dim=1) in fp32 over the valid (unpadded) columns only.
            col = jax.lax.broadcasted_iota(jnp.int32, h.shape, 1)
            valid = col < valid_cols
            h = jnp.where(valid, h, -1e30)
            m = jnp.max(h, axis=1, keepdims=True)
            e = jnp.where(valid, jnp.exp(h - m), 0.0)
            inv = pl.reciprocal(jnp.sum(e, axis=1, keepdims=True), approx=True)
            h = e * inv
        o_ref[...] = h.astype(o_ref.dtype)


def _gcn_layer(s_p, z_p, w_p, b_p, *, block, activation, valid_cols, out_dtype):
    """pallas_call wrapper for one GCNConv layer on padded operands."""
    n_p = s_p.shape[0]
    f_in = z_p.shape[1]      # padded input-feature width   (multiple of 128)
    f_out = w_p.shape[1]     # padded output-feature width  (multiple of 128)
    grid = (n_p // block, n_p // block)

    kernel = functools.partial(gcn_layer_kernel, activation=activation,
                               valid_cols=valid_cols)
    return pl.pallas_call(
        kernel,
        out_shape=jax.ShapeDtypeStruct((n_p, f_out), out_dtype),
        grid_spec=pltpu.PrefetchScalarGridSpec(
            num_scalar_prefetch=0,
            grid=grid,
            in_specs=[
                pl.BlockSpec((block, block), lambda i, k: (i, k)),   # S tile (streamed)
                pl.BlockSpec((block, f_in), lambda i, k: (k, 0)),    # Z contraction tile
                pl.BlockSpec((f_in, f_out), lambda i, k: (0, 0)),    # W (resident)
                pl.BlockSpec((1, f_out), lambda i, k: (0, 0)),       # bias (resident)
            ],
            out_specs=pl.BlockSpec((block, f_out), lambda i, k: (i, 0)),
            scratch_shapes=[pltpu.VMEM((block, f_in), jnp.float32)],  # fp32 accumulator
        ),
        compiler_params=pltpu.CompilerParams(
            dimension_semantics=("parallel", "arbitrary")),
    )(s_p, z_p, w_p, b_p)


def gcn_norm_dense(edge_index, edge_weight, num_nodes):
    """Plain-JAX glue: S = D^{-1/2} (A + I) D^{-1/2}, shape (N, N), fp32.

    PyG GCNConv aggregates messages at the target node (edge_index[1]); the
    dense operator M[t, s] holds the weight of edge s->t (plus self loops),
    so a layer's propagation is  out = S @ x.
    """
    src, dst = edge_index[0], edge_index[1]
    M = jnp.zeros((num_nodes, num_nodes), jnp.float32)
    M = M.at[dst, src].add(edge_weight.astype(jnp.float32))
    M = M + jnp.eye(num_nodes, dtype=jnp.float32)          # self loops (weight 1)
    deg = M.sum(axis=1)
    dinv = jnp.where(deg > 0, 1.0 / jnp.sqrt(deg), 0.0)
    return dinv[:, None] * M * dinv[None, :]


def gcn_forward(x, edge_index, edge_weight, w1, b1, w2, b2, *, max_block=512):
    n, f_in = x.shape
    f_hidden = w1.shape[1]
    f_out = w2.shape[1]

    # ---- pad to TPU-friendly sizes ------------------------------------------
    # node dim: multiple of the row/contraction tile; feature dims: mult. of 128
    block = min(max_block, _round_up(n, 128))
    n_p = _round_up(n, block)
    fi_p = _round_up(f_in, 128)
    fh_p = _round_up(f_hidden, 128)
    fo_p = _round_up(f_out, 128)

    s = gcn_norm_dense(edge_index, edge_weight, n)
    s_p = jnp.zeros((n_p, n_p), jnp.bfloat16).at[:n, :n].set(s.astype(jnp.bfloat16))
    x_p = jnp.zeros((n_p, fi_p), jnp.bfloat16).at[:n, :f_in].set(x.astype(jnp.bfloat16))
    w1_p = jnp.zeros((fi_p, fh_p), jnp.bfloat16).at[:f_in, :f_hidden].set(w1.astype(jnp.bfloat16))
    b1_p = jnp.zeros((1, fh_p), jnp.float32).at[0, :f_hidden].set(b1.astype(jnp.float32))
    w2_p = jnp.zeros((fh_p, fo_p), jnp.bfloat16).at[:f_hidden, :f_out].set(w2.astype(jnp.bfloat16))
    b2_p = jnp.zeros((1, fo_p), jnp.float32).at[0, :f_out].set(b2.astype(jnp.float32))

    # Layer 1: h1 = relu(S @ X @ W1 + b1)   (bf16 intermediate, fp32 accum)
    h1_p = _gcn_layer(s_p, x_p, w1_p, b1_p, block=block,
                      activation="relu", valid_cols=fh_p, out_dtype=jnp.bfloat16)

    # TODO(synk): F.dropout(x, training=self.training) — eval-mode identity here.

    # Layer 2: softmax(S @ h1 @ W2 + b2, dim=1)  over the valid out_feature columns
    out_p = _gcn_layer(s_p, h1_p, w2_p, b2_p, block=block,
                       activation="softmax", valid_cols=f_out, out_dtype=jnp.float32)

    return out_p[:n, :f_out]


def gcn_reference(x, edge_index, edge_weight, w1, b1, w2, b2):
    s = gcn_norm_dense(edge_index, edge_weight, x.shape[0])
    h1 = jnp.maximum(s @ (x @ w1) + b1[None, :], 0.0)
    h2 = s @ (h1 @ w2) + b2[None, :]
    return jax.nn.softmax(h2, axis=1)


if __name__ == "__main__":
    key = jax.random.PRNGKey(0)
    num_nodes = 8
    in_feature = 32
    out_feature = 16

    k_x, k_ew, k_w1, k_w2 = jax.random.split(key, 4)

    # Node features (N, in_feature)
    x = jax.random.normal(k_x, (num_nodes, in_feature), dtype=jnp.float32)

    # A small directed graph: ring plus a few extra edges.
    src = jnp.array([0, 1, 2, 3, 4, 5, 6, 7, 0, 2, 4, 6], dtype=jnp.int32)
    dst = jnp.array([1, 2, 3, 4, 5, 6, 7, 0, 4, 6, 0, 2], dtype=jnp.int32)
    edge_index = jnp.stack([src, dst], axis=0)                 # (2, E)
    edge_weight = jax.random.uniform(k_ew, (src.shape[0],), dtype=jnp.float32,
                                     minval=0.5, maxval=1.5)

    # Deterministic GCNConv parameters (glorot-style scaling).
    w1 = jax.random.normal(k_w1, (in_feature, in_feature), jnp.float32) * (1.0 / jnp.sqrt(in_feature))
    b1 = jnp.zeros((in_feature,), jnp.float32)
    w2 = jax.random.normal(k_w2, (in_feature, out_feature), jnp.float32) * (1.0 / jnp.sqrt(in_feature))
    b2 = jnp.zeros((out_feature,), jnp.float32)

    out = gcn_forward(x, edge_index, edge_weight, w1, b1, w2, b2)
    out = jax.block_until_ready(out)

    ref = gcn_reference(x, edge_index, edge_weight, w1, b1, w2, b2)
    # bf16 MXU inputs + approx reciprocal -> compare at bf16-appropriate tolerance.
    np.testing.assert_allclose(np.asarray(out), np.asarray(ref), rtol=2e-2, atol=2e-2)
    assert out.shape == (num_nodes, out_feature)

    print("KERNEL_OK")
</pallas_src>

<mosaic_0001>
module attributes {stable_mosaic.version = 11 : i64} {
  func.func @gcn_layer_kernel(%arg0: i32, %arg1: i32, %arg2: memref<128x128xbf16, #tpu.memory_space<vmem>>, %arg3: memref<128x128xbf16, #tpu.memory_space<vmem>>, %arg4: memref<128x128xbf16, #tpu.memory_space<vmem>>, %arg5: memref<1x128xf32, #tpu.memory_space<vmem>>, %arg6: memref<128x128xbf16, #tpu.memory_space<vmem>>, %arg7: memref<128x128xf32, #tpu.memory_space<vmem>>) attributes {dimension_semantics = [#tpu.dimension_semantics<parallel>, #tpu.dimension_semantics<arbitrary>], iteration_bounds = array<i64: 1, 1>, scalar_prefetch = 0 : i64, scratch_operands = 1 : i64, tpu.core_type = #tpu.core_type<tc>, window_params = [{transform_indices = @transform_0, window_bounds = array<i64: 128, 128>}, {transform_indices = @transform_1, window_bounds = array<i64: 128, 128>}, {pipeline_mode = #tpu.pipeline_mode<synchronous>, transform_indices = @transform_2, window_bounds = array<i64: 128, 128>}, {pipeline_mode = #tpu.pipeline_mode<synchronous>, transform_indices = @transform_3, window_bounds = array<i64: 1, 128>}, {transform_indices = @transform_4, window_bounds = array<i64: 128, 128>}]} {
    %c0_i32 = arith.constant 0 : i32
    %0 = arith.cmpi eq, %arg1, %c0_i32 : i32
    %1 = arith.extui %0 : i1 to i32
    %c0_i32_0 = arith.constant 0 : i32
    %2 = arith.cmpi ne, %1, %c0_i32_0 : i32
    scf.if %2 {
      %cst_10 = arith.constant 0.000000e+00 : f32
      %12 = vector.broadcast %cst_10 : f32 to vector<128x128xf32>
      %c0_11 = arith.constant 0 : index
      %c0_12 = arith.constant 0 : index
      %13 = vector.load %arg7[%c0_11, %c0_12] : memref<128x128xf32, #tpu.memory_space<vmem>>, vector<128x128xf32>
      tpu.vector_store %arg7[%c0_11, %c0_12], %12 {strides = array<i32>} : memref<128x128xf32, #tpu.memory_space<vmem>>, vector<128x128xf32>,
    } else {
    }
    %c0 = arith.constant 0 : index
    %c0_1 = arith.constant 0 : index
    %3 = vector.load %arg7[%c0, %c0_1] : memref<128x128xf32, #tpu.memory_space<vmem>>, vector<128x128xf32>
    %c0_2 = arith.constant 0 : index
    %c0_3 = arith.constant 0 : index
    %4 = vector.load %arg2[%c0_2, %c0_3] : memref<128x128xbf16, #tpu.memory_space<vmem>>, vector<128x128xbf16>
    %c0_4 = arith.constant 0 : index
    %c0_5 = arith.constant 0 : index
    %5 = vector.load %arg3[%c0_4, %c0_5] : memref<128x128xbf16, #tpu.memory_space<vmem>>, vector<128x128xbf16>
    %cst = arith.constant dense<0.000000e+00> : vector<128x128xf32>
    %6 = tpu.matmul %4, %5, %cst {dimension_numbers = #tpu.dot_dimension_numbers<[1], [0], [0], [1], [0, 0, 1, 1], [], []>} : vector<128x128xbf16>, vector<128x128xbf16>, vector<128x128xf32> -> vector<128x128xf32>
    %7 = arith.addf %3, %6 : vector<128x128xf32>
    %c0_6 = arith.constant 0 : index
    %c0_7 = arith.constant 0 : index
    %8 = vector.load %arg7[%c0_6, %c0_7] : memref<128x128xf32, #tpu.memory_space<vmem>>, vector<128x128xf32>
    tpu.vector_store %arg7[%c0_6, %c0_7], %7 {strides = array<i32>} : memref<128x128xf32, #tpu.memory_space<vmem>>, vector<128x128xf32>,
    %c0_i32_8 = arith.constant 0 : i32
    %9 = arith.cmpi eq, %arg1, %c0_i32_8 : i32
    %10 = arith.extui %9 : i1 to i32
    %c0_i32_9 = arith.constant 0 : i32
    %11 = arith.cmpi ne, %10, %c0_i32_9 : i32
    scf.if %11 {
      %c0_10 = arith.constant 0 : index
      %c0_11 = arith.constant 0 : index
      %12 = vector.load %arg7[%c0_10, %c0_11] : memref<128x128xf32, #tpu.memory_space<vmem>>, vector<128x128xf32>
      %13 = arith.truncf %12 : vector<128x128xf32> to vector<128x128xbf16>
      %c0_12 = arith.constant 0 : index
      %c0_13 = arith.constant 0 : index
      %14 = vector.load %arg4[%c0_12, %c0_13] : memref<128x128xbf16, #tpu.memory_space<vmem>>, vector<128x128xbf16>
      %cst_14 = arith.constant dense<0.000000e+00> : vector<128x128xf32>
      %15 = tpu.matmul %13, %14, %cst_14 {dimension_numbers = #tpu.dot_dimension_numbers<[1], [0], [0], [1], [0, 0, 1, 1], [], []>} : vector<128x128xbf16>, vector<128x128xbf16>, vector<128x128xf32> -> vector<128x128xf32>
      %c0_15 = arith.constant 0 : index
      %c0_16 = arith.constant 0 : index
      %16 = vector.load %arg5[%c0_15, %c0_16] : memref<1x128xf32, #tpu.memory_space<vmem>>, vector<1x128xf32>
      %17 = vector.broadcast %16 : vector<1x128xf32> to vector<128x128xf32>
      %18 = arith.addf %15, %17 : vector<128x128xf32>
      %cst_17 = arith.constant 0.000000e+00 : f32
      %19 = vector.broadcast %cst_17 : f32 to vector<128x128xf32>
      %20 = arith.maximumf %18, %19 : vector<128x128xf32>
      %21 = arith.truncf %20 : vector<128x128xf32> to vector<128x128xbf16>
      %c0_18 = arith.constant 0 : index
      %c0_19 = arith.constant 0 : index
      %22 = vector.load %arg6[%c0_18, %c0_19] : memref<128x128xbf16, #tpu.memory_space<vmem>>, vector<128x128xbf16>
      tpu.vector_store %arg6[%c0_18, %c0_19], %21 {strides = array<i32>} : memref<128x128xbf16, #tpu.memory_space<vmem>>, vector<128x128xbf16>,
    } else {
    }
    return
  }
  func.func @transform_0(%arg0: i32, %arg1: i32) -> (i32, i32) {
    %c0_i32 = arith.constant 0 : i32
    return %arg0, %arg1 : i32, i32
  }
  func.func @transform_1(%arg0: i32, %arg1: i32) -> (i32, i32) {
    %c0_i32 = arith.constant 0 : i32
    %c0_i32_0 = arith.constant 0 : i32
    return %arg1, %c0_i32 : i32, i32
  }
  func.func @transform_2(%arg0: i32, %arg1: i32) -> (i32, i32) {
    %c0_i32 = arith.constant 0 : i32
    %c0_i32_0 = arith.constant 0 : i32
    %c0_i32_1 = arith.constant 0 : i32
    return %c0_i32, %c0_i32_0 : i32, i32
  }
  func.func @transform_3(%arg0: i32, %arg1: i32) -> (i32, i32) {
    %c0_i32 = arith.constant 0 : i32
    %c0_i32_0 = arith.constant 0 : i32
    %c0_i32_1 = arith.constant 0 : i32
    return %c0_i32, %c0_i32_0 : i32, i32
  }
  func.func @transform_4(%arg0: i32, %arg1: i32) -> (i32, i32) {
    %c0_i32 = arith.constant 0 : i32
    %c0_i32_0 = arith.constant 0 : i32
    return %arg0, %c0_i32 : i32, i32
  }
}

</mosaic_0001>

<bundles_post_ra>
// kernel: tpu_custom_call.1
= control target key start
LH: loop header
LB: loop body
LE: loop exit
PB: predicated region body
PF: predicated region fallthrough
CT: control target
= control target key end

     0   :  { %9 = vsyncpa [#allocation4], 0  ;;  %s1036_s0 = inlined_call_operand.hbm [shape: bf16[128,128], index: 0, kind: input, shape index: {}]   ;;  %s1037_s1 = inlined_call_operand.hbm [shape: bf16[128,128], index: 1, kind: input, shape index: {}]   ;;  %s1038_s2 = inlined_call_operand.hbm [shape: bf16[128,128], index: 2, kind: input, shape index: {}]   ;;  %s1039_s3 = inlined_call_operand.vmem [shape: f32[1,128], index: 3, kind: input, shape index: {}]   ;;  %s1040_s4 = inlined_call_operand.hbm [shape: bf16[128,128], index: 4, kind: output, shape index: {}]  }
   0x1   :  { %10 = vsyncpa [#allocation7], 0 }
   0x2   :  { %11 = vsyncpa [#allocation5], 0  ;;  %s978_s15 = smov [#allocation6]   ;;  %s979_s17 = smov [#allocation3]  }
   0x3   :  { %s29_s16 = sshll.u32 %s978_s15, 4  ;;  %s17_s18 = sshll.u32 %s979_s17, 4  ;;  %s30_s16 = int_to_ptr.vmem [resolvable:$true] %s29_s16  ;;  %s18_s18 = int_to_ptr.vmem [resolvable:$true] %s17_s18 }
   0x4   :  { %s900_s19 = scalar_lea.vmem %s30_s16, 1024  ;;  %p905_p1 = scmp.lt.s32.totalorder %s30_s16, %s30_s16 }
   0x5   :  { %p901_p0 = scmp.ne.s32.totalorder %s30_s16, %s900_s19  ;;  %p906_p2 = scmp.lt.s32.totalorder %s900_s19, %s900_s19 }
   0x7   :  { %p907_p3 = por %p906_p2, %p905_p1 }
   0x9   :  { %p908_p4 = pnand %p907_p3, %p901_p0 }
   0xb   :  { %911 = shalt.err (!%p908_p4)
}
   0xc   :  { %s980_s20 = smov 64   ;;  %s981_s21 = smov 4  }
   0xd   :  { %35 = dma.hbm_to_vmem [thread:$0]  %s1037_s1, 1024, %s30_s16, [#allocation7], %s980_s20, %s980_s20, %s981_s21  }
   0xe   :  { %s920_s24 = scalar_lea.vmem %s18_s18, 1024  ;;  %p925_p6 = scmp.lt.s32.totalorder %s18_s18, %s18_s18 }
   0xf   :  { %p921_p5 = scmp.ne.s32.totalorder %s18_s18, %s920_s24  ;;  %p926_p7 = scmp.lt.s32.totalorder %s920_s24, %s920_s24 }
  0x11   :  { %p927_p8 = por %p926_p7, %p925_p6 }
  0x13   :  { %p928_p9 = pnand %p927_p8, %p921_p5 }
  0x15   :  { %931 = shalt.err (!%p928_p9)
}
  0x16   :  { %23 = dma.hbm_to_vmem [thread:$0]  %s1036_s0, 1024, %s18_s18, [#allocation4], %s980_s20, %s980_s20, %s981_s21  }
  0x17   :  { %s982_s27 = smov [#allocation8]  }
  0x18   :  { %s41_s28 = sshll.u32 %s982_s27, 4  ;;  %s42_s28 = int_to_ptr.vmem [resolvable:$true] %s41_s28 }
  0x19   :  { %s940_s29 = scalar_lea.vmem %s42_s28, 1024  ;;  %p945_p11 = scmp.lt.s32.totalorder %s42_s28, %s42_s28 }
  0x1a   :  { %p941_p10 = scmp.ne.s32.totalorder %s42_s28, %s940_s29  ;;  %p946_p12 = scmp.lt.s32.totalorder %s940_s29, %s940_s29 }
  0x1c   :  { %p947_p13 = por %p946_p12, %p945_p11 }
  0x1e   :  { %p948_p0 = pnand %p947_p13, %p941_p10 }
  0x20   :  { %951 = shalt.err (!%p948_p0)
}
  0x21   :  { %47 = dma.hbm_to_vmem [thread:$0]  %s1038_s2, 1024, %s42_s28, [#allocation7], %s980_s20, %s980_s20, %s981_s21  }
  0x22   :  { %972 = dma.done.wait [#allocation4], 1024  }
  0x23   :  { %973 = vsyncadd [#allocation4], 4294966272 }
  0x24   :  { %974 = dma.done.wait [#allocation7], 2048  }
  0x25   :  { %975 = vsyncadd [#allocation7], 4294965248  ;;  %v868_v0 = vld [vmem:[#allocation6 + $0x38] sm:$0xff]   ;;  %v869_v1 = vld [vmem:[#allocation6 + $0x30] sm:$0xff]  }
  0x26   :  { %798 = vmatprep.subr.bf16.mxu0 %v868_v0  ;;  %v870_v2 = vld [vmem:[#allocation6 + $0x28] sm:$0xff]   ;;  %v871_v3 = vld [vmem:[#allocation6 + $0x20] sm:$0xff]   ;;  %v872_v5 = vld [vmem:[#allocation6 + $0x18] sm:$0xff]  }
  0x27   :  { %799 = vmatpush3.bf16.msra.mxu0 %v868_v0  ;;  %v876_v4 = vld [vmem:[#allocation3] sm:$0xff]   ;;  %v873_v6 = vld [vmem:[#allocation6 + $0x10] sm:$0xff]   ;;  %v884_v7 = vld [vmem:[#allocation8 + $0x38] sm:$0xff]  }
  0x28   :  { %800 = vmatprep.subr.bf16.mxu0 %v869_v1  ;;  %814 = vmatprep.mubr.bf16.mxu0 %v876_v4  ;;  %v885_v8 = vld [vmem:[#allocation8 + $0x30] sm:$0xff]   ;;  %v874_v9 = vld [vmem:[#allocation6 + $0x8] sm:$0xff]   ;;  %v875_v11 = vld [vmem:[#allocation6] sm:$0xff]  }
  0x29   :  { %830 = vmatprep.subr.bf16.mxu1 %v884_v7  ;;  %v886_v10 = vld [vmem:[#allocation8 + $0x28] sm:$0xff]   ;;  %v887_v12 = vld [vmem:[#allocation8 + $0x20] sm:$0xff]   ;;  %v888_v13 = vld [vmem:[#allocation8 + $0x18] sm:$0xff]  }
  0x2a   :  { %831 = vmatpush3.bf16.msra.mxu1 %v884_v7  ;;  %v877_v14 = vld [vmem:[#allocation3 + $0x8] sm:$0xff]   ;;  %v878_v15 = vld [vmem:[#allocation3 + $0x10] sm:$0xff]   ;;  %v879_v17 = vld [vmem:[#allocation3 + $0x18] sm:$0xff]  }
  0x2b   :  { %801 = vmatpush3.bf16.msra.mxu0 %v869_v1  ;;  %832 = vmatprep.subr.bf16.mxu1 %v885_v8  ;;  %v889_v16 = vld [vmem:[#allocation8 + $0x10] sm:$0xff]   ;;  %v880_v18 = vld [vmem:[#allocation3 + $0x20] sm:$0xff]   ;;  %v881_v19 = vld [vmem:[#allocation3 + $0x28] sm:$0xff]  }
  0x2c   :  { %802 = vmatprep.subr.bf16.mxu0 %v870_v2  ;;  %v882_v20 = vld [vmem:[#allocation3 + $0x30] sm:$0xff]   ;;  %v883_v21 = vld [vmem:[#allocation3 + $0x38] sm:$0xff]   ;;  %v890_v22 = vld [vmem:[#allocation8 + $0x8] sm:$0xff]  }
  0x2d   :  { %v891_v23 = vld [vmem:[#allocation8] sm:$0xff]  }
  0x2e   :  { %833 = vmatpush3.bf16.msra.mxu1 %v885_v8  ;;  %v678_v49 = vld [vmem:[%s1039_s3] ss:$0 sm:$0xff]  ;;  %s983_s3 = smov [#allocation9]  }
  0x2f   :  { %803 = vmatpush3.bf16.msra.mxu0 %v870_v2  ;;  %834 = vmatprep.subr.bf16.mxu1 %v886_v10  ;;  %s649_s5 = sshll.u32 %s983_s3, 4  ;;  %s650_s5 = int_to_ptr.vmem [resolvable:$true] %s649_s5 }
  0x30   :  { %804 = vmatprep.subr.bf16.mxu0 %v871_v3  ;;  %s952_s6 = scalar_lea.vmem %s650_s5, 1024  ;;  %p957_p2 = scmp.lt.s32.totalorder %s650_s5, %s650_s5 }
  0x31   :  { %p953_p1 = scmp.ne.s32.totalorder %s650_s5, %s952_s6  ;;  %p958_p3 = scmp.lt.s32.totalorder %s952_s6, %s952_s6 }
  0x32   :  { %835 = vmatpush3.bf16.msra.mxu1 %v886_v10 }
  0x33   :  { %805 = vmatpush3.bf16.msra.mxu0 %v871_v3  ;;  %836 = vmatprep.subr.bf16.mxu1 %v887_v12  ;;  %p959_p4 = por %p958_p3, %p957_p2 }
  0x34   :  { %806 = vmatprep.subr.bf16.mxu0 %v872_v5 }
  0x35   :  { %p960_p5 = pnand %p959_p4, %p953_p1 }
  0x36   :  { %837 = vmatpush3.bf16.msra.mxu1 %v887_v12 }
  0x37   :  { %807 = vmatpush3.bf16.msra.mxu0 %v872_v5  ;;  %838 = vmatprep.subr.bf16.mxu1 %v888_v13 }
  0x38   :  { %808 = vmatprep.subr.bf16.mxu0 %v873_v6 }
  0x3a   :  { %839 = vmatpush3.bf16.msra.mxu1 %v888_v13 }
  0x3b   :  { %809 = vmatpush3.bf16.msra.mxu0 %v873_v6  ;;  %840 = vmatprep.subr.bf16.mxu1 %v889_v16 }
  0x3c   :  { %810 = vmatprep.subr.bf16.mxu0 %v874_v9 }
  0x3e   :  { %841 = vmatpush3.bf16.msra.mxu1 %v889_v16 }
  0x3f   :  { %811 = vmatpush3.bf16.msra.mxu0 %v874_v9  ;;  %842 = vmatprep.subr.bf16.mxu1 %v890_v22 }
  0x40   :  { %812 = vmatprep.subr.bf16.mxu0 %v875_v11 }
  0x42   :  { %843 = vmatpush3.bf16.msra.mxu1 %v890_v22 }
  0x43   :  { %813 = vmatpush3.bf16.msra.mxu0 %v875_v11  ;;  %844 = vmatprep.subr.bf16.mxu1 %v891_v23 }
  0x46   :  { %815 = vmatmul.mubr.bf16.vlgmr.msra.gmra.mxu0 %v877_v14  ;;  %845 = vmatpush3.bf16.msra.mxu1 %v891_v23 }
  0x47   :  { %818 = vmatprep.mubr.bf16.mxu0 %v878_v15 }
  0x4e   :  { %819 = vmatmul.mubr.bf16.gmra.mxu0 %v879_v17 }
  0x4f   :  { %822 = vmatprep.mubr.bf16.mxu0 %v880_v18 }
  0x56   :  { %823 = vmatmul.mubr.bf16.gmra.mxu0 %v881_v19 }
  0x57   :  { %826 = vmatprep.mubr.bf16.mxu0 %v882_v20 }
  0x5e   :  { %827 = vmatmul.mubr.bf16.gmra.mxu0 %v883_v21 }
 0x106   :  { %v816_v24 = vpop.f32.mrf.mxu0 }
 0x108   :  { %v258_v25 = vpop.f32.mrf.mxu0 }
 0x10a   :  { %v817_v26 = vpop.f32.mrf.mxu0 }
 0x10b   :  { %v373_v29 = vpack.c.bf16 %v817_v26, %v816_v24 }
 0x10c   :  { %v261_v27 = vpop.f32.mrf.mxu0 }
 0x10d   :  { %v372_v28 = vpack.c.bf16 %v261_v27, %v258_v25 }
 0x10e   :  { %v820_v30 = vpop.f32.mrf.mxu0 }
 0x10f   :  { %846 = vmatprep.mubr.bf16.mxu1 %v372_v28 }
 0x110   :  { %v274_v31 = vpop.f32.mrf.mxu0  ;;  %847 = vmatmul.mubr.bf16.vlgmr.msra.gmra.mxu1 %v373_v29 }
 0x112   :  { %v821_v32 = vpop.f32.mrf.mxu0 }
 0x113   :  { %v375_v35 = vpack.c.bf16 %v821_v32, %v820_v30 }
 0x114   :  { %v277_v33 = vpop.f32.mrf.mxu0 }
 0x115   :  { %v374_v34 = vpack.c.bf16 %v277_v33, %v274_v31 }
 0x116   :  { %v824_v36 = vpop.f32.mrf.mxu0 }
 0x117   :  { %850 = vmatprep.mubr.bf16.mxu1 %v374_v34 }
 0x118   :  { %v290_v37 = vpop.f32.mrf.mxu0  ;;  %851 = vmatmul.mubr.bf16.gmra.mxu1 %v375_v35 }
 0x11a   :  { %v825_v38 = vpop.f32.mrf.mxu0 }
 0x11b   :  { %v377_v41 = vpack.c.bf16 %v825_v38, %v824_v36 }
 0x11c   :  { %v293_v39 = vpop.f32.mrf.mxu0 }
 0x11d   :  { %v376_v40 = vpack.c.bf16 %v293_v39, %v290_v37 }
 0x11e   :  { %v828_v42 = vpop.f32.mrf.mxu0 }
 0x11f   :  { %854 = vmatprep.mubr.bf16.mxu1 %v376_v40 }
 0x120   :  { %v306_v43 = vpop.f32.mrf.mxu0  ;;  %855 = vmatmul.mubr.bf16.gmra.mxu1 %v377_v41 }
 0x122   :  { %v829_v44 = vpop.f32.mrf.mxu0 }
 0x123   :  { %v379_v47 = vpack.c.bf16 %v829_v44, %v828_v42 }
 0x124   :  { %v309_v45 = vpop.f32.mrf.mxu0 }
 0x125   :  { %v378_v46 = vpack.c.bf16 %v309_v45, %v306_v43 }
 0x127   :  { %858 = vmatprep.mubr.bf16.mxu1 %v378_v46 }
 0x128   :  { %859 = vmatmul.mubr.bf16.gmra.mxu1 %v379_v47 }
 0x1d0   :  { %v848_v48 = vpop.f32.mrf.mxu1 }
 0x1d1   :  { %v494_v51 = vadd.f32 %v848_v48, %v678_v49 }
 0x1d2   :  { %v485_v50 = vpop.f32.mrf.mxu1 }
 0x1d3   :  { %v486_v53 = vadd.f32 %v678_v49, %v485_v50  ;;  %v550_v56 = vmax.f32 %v494_v51, 0.0 }
 0x1d4   :  { %v849_v52 = vpop.f32.mrf.mxu1 }
 0x1d5   :  { %v497_v54 = vadd.f32 %v849_v52, %v678_v49  ;;  %v548_v60 = vmax.f32 %v486_v53, 0.0 }
 0x1d6   :  { %v488_v55 = vpop.f32.mrf.mxu1 }
 0x1d7   :  { %v551_v57 = vmax.f32 %v497_v54, 0.0  ;;  %v489_v58 = vadd.f32 %v678_v49, %v488_v55 }
 0x1d8   :  { %v852_v59 = vpop.f32.mrf.mxu1 }
 0x1d9   :  { %v727_v61 = vpack.c.bf16 %v551_v57, %v550_v56  ;;  %v549_v62 = vmax.f32 %v489_v58, 0.0  ;;  %v510_v1 = vadd.f32 %v852_v59, %v678_v49 }
 0x1da   :  { %v501_v63 = vpop.f32.mrf.mxu1 }
 0x1db   :  { %759 = vst [vmem:[#allocation9 + $0x8] sm:$0xff] %v727_v61   ;;  %v722_v0 = vpack.c.bf16 %v549_v62, %v548_v60  ;;  %v502_v3 = vadd.f32 %v678_v49, %v501_v63  ;;  %v554_v6 = vmax.f32 %v510_v1, 0.0 }
 0x1dc   :  { %v853_v2 = vpop.f32.mrf.mxu1 }
 0x1dd   :  { %723 = vst [vmem:[#allocation9] sm:$0xff] %v722_v0   ;;  %v513_v4 = vadd.f32 %v853_v2, %v678_v49  ;;  %v552_v10 = vmax.f32 %v502_v3, 0.0 }
 0x1de   :  { %v504_v5 = vpop.f32.mrf.mxu1 }
 0x1df   :  { %v555_v7 = vmax.f32 %v513_v4, 0.0  ;;  %v505_v8 = vadd.f32 %v678_v49, %v504_v5 }
 0x1e0   :  { %v856_v9 = vpop.f32.mrf.mxu1 }
 0x1e1   :  { %v737_v11 = vpack.c.bf16 %v555_v7, %v554_v6  ;;  %v553_v12 = vmax.f32 %v505_v8, 0.0  ;;  %v526_v15 = vadd.f32 %v856_v9, %v678_v49 }
 0x1e2   :  { %v517_v13 = vpop.f32.mrf.mxu1 }
 0x1e3   :  { %761 = vst [vmem:[#allocation9 + $0x18] sm:$0xff] %v737_v11   ;;  %v732_v14 = vpack.c.bf16 %v553_v12, %v552_v10  ;;  %v518_v17 = vadd.f32 %v678_v49, %v517_v13  ;;  %v558_v20 = vmax.f32 %v526_v15, 0.0 }
 0x1e4   :  { %v857_v16 = vpop.f32.mrf.mxu1 }
 0x1e5   :  { %760 = vst [vmem:[#allocation9 + $0x10] sm:$0xff] %v732_v14   ;;  %v529_v18 = vadd.f32 %v857_v16, %v678_v49  ;;  %v556_v24 = vmax.f32 %v518_v17, 0.0 }
 0x1e6   :  { %v520_v19 = vpop.f32.mrf.mxu1 }
 0x1e7   :  { %v559_v21 = vmax.f32 %v529_v18, 0.0  ;;  %v521_v22 = vadd.f32 %v678_v49, %v520_v19 }
 0x1e8   :  { %v860_v23 = vpop.f32.mrf.mxu1 }
 0x1e9   :  { %v747_v25 = vpack.c.bf16 %v559_v21, %v558_v20  ;;  %v557_v26 = vmax.f32 %v521_v22, 0.0  ;;  %v542_v29 = vadd.f32 %v860_v23, %v678_v49 }
 0x1ea   :  { %v533_v27 = vpop.f32.mrf.mxu1 }
 0x1eb   :  { %763 = vst [vmem:[#allocation9 + $0x28] sm:$0xff] %v747_v25   ;;  %v742_v28 = vpack.c.bf16 %v557_v26, %v556_v24  ;;  %v534_v31 = vadd.f32 %v678_v49, %v533_v27  ;;  %v562_v34 = vmax.f32 %v542_v29, 0.0 }
 0x1ec   :  { %v861_v30 = vpop.f32.mrf.mxu1 }
 0x1ed   :  { %762 = vst [vmem:[#allocation9 + $0x20] sm:$0xff] %v742_v28   ;;  %v545_v32 = vadd.f32 %v861_v30, %v678_v49  ;;  %v560_v37 = vmax.f32 %v534_v31, 0.0 }
 0x1ee   :  { %v536_v33 = vpop.f32.mrf.mxu1 }
 0x1ef   :  { %v563_v35 = vmax.f32 %v545_v32, 0.0  ;;  %v537_v36 = vadd.f32 %v678_v49, %v536_v33 }
 0x1f1   :  { %v757_v38 = vpack.c.bf16 %v563_v35, %v562_v34  ;;  %v561_v39 = vmax.f32 %v537_v36, 0.0 }
 0x1f3   :  { %765 = vst [vmem:[#allocation9 + $0x38] sm:$0xff] %v757_v38   ;;  %v752_v40 = vpack.c.bf16 %v561_v39, %v560_v37 }
 0x1f5   :  { %764 = vst [vmem:[#allocation9 + $0x30] sm:$0xff] %v752_v40  }
 0x1f6   :  { %963 = shalt.err (!%p960_p5)
}
 0x1f7   :  { %655 = dma.vmem_to_hbm [thread:$0]  %s650_s5, 1024, %s1040_s4, [#allocation5], %s980_s20, %s980_s20, %s981_s21  }
 0x1f8   :  { %976 = dma.done.wait [#allocation5], 1024  }
 0x1f9   :  { %977 = vsyncadd [#allocation5], 4294966272 }
 0x1fa   :  { %659 = vsyncpa [#allocation4], 1 }
 0x1fb   :  { %660 = vsyncpa [#allocation7], 1 }
 0x1fc   :  { %661 = vsyncpa [#allocation5], 1 }

</bundles_post_ra>
